<compile_context>
chip_gen: v5e
topology: v5e:2x2
jax: 0.10.0
libtpu: 0.0.40
codegen_flags: <defaults>
</compile_context>

<pallas_src>
import jax
import jax.numpy as jnp
from jax.experimental import pallas as pl
from jax.experimental.pallas import tpu as pltpu

_IN = 784      # 28*28, kept un-padded (full last dim of x / first dim of W1)
_H1_P = 128    # 100 -> 128
_H2_P = 128    # 48  -> 128
_OUT_P = 128   # 10  -> 128
_MAX_TB = 1024  # safe on every generation with the explicit VMEM limit below


def _round_up(x, m):
    return (x + m - 1) // m * m


def _mlp_kernel(x_ref, w1_ref, b1_ref, w2_ref, b2_ref, w3_ref, b3_ref, o_ref):
    # x_ref: [TB, 784] f32; weights bf16; biases f32 [1, 128]; o_ref [TB, 128] bf16.
    x = x_ref[...].astype(jnp.bfloat16)                       # cast in VMEM, not HBM

    h1 = jnp.dot(x, w1_ref[...], preferred_element_type=jnp.float32)
    h1 = jnp.maximum(h1 + b1_ref[...], 0.0)                   # f32 bias + ReLU

    h2 = jnp.dot(h1.astype(jnp.bfloat16), w2_ref[...],
                 preferred_element_type=jnp.float32)
    h2 = jnp.maximum(h2 + b2_ref[...], 0.0)

    y = jnp.dot(h2.astype(jnp.bfloat16), w3_ref[...],
                preferred_element_type=jnp.float32)
    o_ref[...] = (y + b3_ref[...]).astype(o_ref.dtype)


def prepare_params(w1, b1, w2, b2, w3, b3):
    """Pad/cast parameters once, outside the per-call forward path.

    Expects weights in [in, out] layout (PyTorch nn.Linear stores [out, in];
    transpose before calling) and 1-D biases of shape [out].
    """
    def pad_w(w, rows, cols):
        r, c = w.shape
        return jnp.pad(jnp.asarray(w, jnp.float32),
                       ((0, rows - r), (0, cols - c))).astype(jnp.bfloat16)

    def pad_b(b, cols):
        b = jnp.asarray(b, jnp.float32).reshape(1, -1)
        return jnp.pad(b, ((0, 0), (0, cols - b.shape[1])))

    return (pad_w(w1, _IN, _H1_P), pad_b(b1, _H1_P),
            pad_w(w2, _H1_P, _H2_P), pad_b(b2, _H2_P),
            pad_w(w3, _H2_P, _OUT_P), pad_b(b3, _OUT_P))


@jax.jit
def net_forward(x, w1_p, b1_p, w2_p, b2_p, w3_p, b3_p):
    """Forward pass of Net. x: [B, 1, 28, 28] f32, pre-padded params -> [B, 10] f32."""
    B = x.shape[0]
    x_flat = x.reshape(B, _IN).astype(jnp.float32)   # no feature padding, no bf16 copy

    # Balanced batch tiling: >=2 tiles when the batch is big enough (v7x
    # megacore), TB a multiple of 16, padding waste < TB rows, no pad copy.
    n_tiles = max(pl.cdiv(B, _MAX_TB), 2 if B >= 32 else 1)
    TB = _round_up(pl.cdiv(B, n_tiles), 16)
    grid = (pl.cdiv(B, TB),)

    rows_covered = grid[0] * TB
    flops = 2 * rows_covered * (_IN * _H1_P + _H1_P * _H2_P + _H2_P * _OUT_P)
    bytes_accessed = (
        B * _IN * 4                                              # x read (f32)
        + (w1_p.size + w2_p.size + w3_p.size) * 2                # bf16 weights
        + (b1_p.size + b2_p.size + b3_p.size) * 4                # f32 biases
        + B * _OUT_P * 2                                         # bf16 out write
    )

    out = pl.pallas_call(
        _mlp_kernel,
        out_shape=jax.ShapeDtypeStruct((B, _OUT_P), jnp.bfloat16),
        grid_spec=pltpu.PrefetchScalarGridSpec(
            num_scalar_prefetch=0,
            grid=grid,
            in_specs=[
                pl.BlockSpec((TB, _IN), lambda i: (i, 0)),         # x tile (f32)
                pl.BlockSpec((_IN, _H1_P), lambda i: (0, 0)),      # W1, VMEM-resident
                pl.BlockSpec((1, _H1_P), lambda i: (0, 0)),        # b1
                pl.BlockSpec((_H1_P, _H2_P), lambda i: (0, 0)),    # W2
                pl.BlockSpec((1, _H2_P), lambda i: (0, 0)),        # b2
                pl.BlockSpec((_H2_P, _OUT_P), lambda i: (0, 0)),   # W3
                pl.BlockSpec((1, _OUT_P), lambda i: (0, 0)),       # b3
            ],
            out_specs=pl.BlockSpec((TB, _OUT_P), lambda i: (i, 0)),
        ),
        compiler_params=pltpu.CompilerParams(
            dimension_semantics=("parallel",),       # batch tiles over the TCs
            vmem_limit_bytes=32 * 1024 * 1024,       # TB=1024 f32 tiles fit everywhere
        ),
        cost_estimate=pl.CostEstimate(
            flops=flops, transcendentals=0, bytes_accessed=bytes_accessed),
    )(x_flat, w1_p, b1_p, w2_p, b2_p, w3_p, b3_p)

    # Drop the zero-padded logit lanes; return f32 logits.
    return out[:, :10].astype(jnp.float32)


def init_params(key):
    """Deterministic init matching nn.Linear fan-in (weights in [in, out], 1-D biases)."""
    k1, k2, k3, k4, k5, k6 = jax.random.split(key, 6)

    def uniform_init(k, shape, fan_in):
        bound = 1.0 / jnp.sqrt(jnp.float32(fan_in))
        return jax.random.uniform(k, shape, jnp.float32, -bound, bound)

    w1 = uniform_init(k1, (784, 100), 784)
    b1 = uniform_init(k2, (100,), 784)
    w2 = uniform_init(k3, (100, 48), 100)
    b2 = uniform_init(k4, (48,), 100)
    w3 = uniform_init(k5, (48, 10), 48)
    b3 = uniform_init(k6, (10,), 48)
    return w1, b1, w2, b2, w3, b3


if __name__ == "__main__":
    key = jax.random.PRNGKey(0)
    kx, kp = jax.random.split(key)

    B = 32  # two batch tiles of 16 rows -> exercises the parallel grid path
    x = jax.random.normal(kx, (B, 1, 28, 28), dtype=jnp.float32)
    params = init_params(kp)

    padded_params = prepare_params(*params)          # hoisted out of the hot path
    logits = net_forward(x, *padded_params)
    jax.block_until_ready(logits)
    assert logits.shape == (B, 10)

    # Reference in plain JAX, mirroring the kernel's bf16 matmul inputs + f32 accum.
    # NOTE: bf16 casting of x/weights and bf16 logits deviate from a pure f32
    # PyTorch forward by ~1e-2 relative -- fine for MNIST.
    w1, b1, w2, b2, w3, b3 = params
    hi = jax.lax.Precision.HIGHEST

    def bf(a):
        return a.astype(jnp.bfloat16).astype(jnp.float32)

    xf = x.reshape(B, -1)
    h1 = jnp.maximum(jnp.dot(bf(xf), bf(w1), precision=hi) + b1, 0.0)
    h2 = jnp.maximum(jnp.dot(bf(h1), bf(w2), precision=hi) + b2, 0.0)
    ref = jnp.dot(bf(h2), bf(w3), precision=hi) + b3

    assert jnp.all(jnp.isfinite(logits))
    assert jnp.allclose(logits, ref, atol=2e-2, rtol=2e-2)

    print("KERNEL_OK")
</pallas_src>

<mosaic_0001>
module attributes {stable_mosaic.version = 11 : i64} {
  func.func @_mlp_kernel(%arg0: i32, %arg1: memref<16x784xf32, #tpu.memory_space<vmem>>, %arg2: memref<784x128xbf16, #tpu.memory_space<vmem>>, %arg3: memref<1x128xf32, #tpu.memory_space<vmem>>, %arg4: memref<128x128xbf16, #tpu.memory_space<vmem>>, %arg5: memref<1x128xf32, #tpu.memory_space<vmem>>, %arg6: memref<128x128xbf16, #tpu.memory_space<vmem>>, %arg7: memref<1x128xf32, #tpu.memory_space<vmem>>, %arg8: memref<16x128xbf16, #tpu.memory_space<vmem>>) attributes {dimension_semantics = [#tpu.dimension_semantics<parallel>], iteration_bounds = array<i64: 2>, scalar_prefetch = 0 : i64, scratch_operands = 0 : i64, tpu.core_type = #tpu.core_type<tc>, window_params = [{transform_indices = @transform_0, window_bounds = array<i64: 16, 784>}, {pipeline_mode = #tpu.pipeline_mode<synchronous>, transform_indices = @transform_1, window_bounds = array<i64: 784, 128>}, {pipeline_mode = #tpu.pipeline_mode<synchronous>, transform_indices = @transform_2, window_bounds = array<i64: 1, 128>}, {pipeline_mode = #tpu.pipeline_mode<synchronous>, transform_indices = @transform_3, window_bounds = array<i64: 128, 128>}, {pipeline_mode = #tpu.pipeline_mode<synchronous>, transform_indices = @transform_4, window_bounds = array<i64: 1, 128>}, {pipeline_mode = #tpu.pipeline_mode<synchronous>, transform_indices = @transform_5, window_bounds = array<i64: 128, 128>}, {pipeline_mode = #tpu.pipeline_mode<synchronous>, transform_indices = @transform_6, window_bounds = array<i64: 1, 128>}, {transform_indices = @transform_7, window_bounds = array<i64: 16, 128>}]} {
    %c0 = arith.constant 0 : index
    %c0_0 = arith.constant 0 : index
    %0 = vector.load %arg1[%c0, %c0_0] : memref<16x784xf32, #tpu.memory_space<vmem>>, vector<16x784xf32>
    %1 = arith.truncf %0 : vector<16x784xf32> to vector<16x784xbf16>
    %c0_1 = arith.constant 0 : index
    %c0_2 = arith.constant 0 : index
    %2 = vector.load %arg2[%c0_1, %c0_2] : memref<784x128xbf16, #tpu.memory_space<vmem>>, vector<784x128xbf16>
    %cst = arith.constant dense<0.000000e+00> : vector<16x128xf32>
    %3 = tpu.matmul %1, %2, %cst {dimension_numbers = #tpu.dot_dimension_numbers<[1], [0], [0], [1], [0, 0, 1, 1], [], []>} : vector<16x784xbf16>, vector<784x128xbf16>, vector<16x128xf32> -> vector<16x128xf32>
    %c0_3 = arith.constant 0 : index
    %c0_4 = arith.constant 0 : index
    %4 = vector.load %arg3[%c0_3, %c0_4] : memref<1x128xf32, #tpu.memory_space<vmem>>, vector<1x128xf32>
    %5 = vector.broadcast %4 : vector<1x128xf32> to vector<16x128xf32>
    %6 = arith.addf %3, %5 : vector<16x128xf32>
    %cst_5 = arith.constant 0.000000e+00 : f32
    %7 = vector.broadcast %cst_5 : f32 to vector<16x128xf32>
    %8 = arith.maximumf %6, %7 : vector<16x128xf32>
    %9 = arith.truncf %8 : vector<16x128xf32> to vector<16x128xbf16>
    %c0_6 = arith.constant 0 : index
    %c0_7 = arith.constant 0 : index
    %10 = vector.load %arg4[%c0_6, %c0_7] : memref<128x128xbf16, #tpu.memory_space<vmem>>, vector<128x128xbf16>
    %cst_8 = arith.constant dense<0.000000e+00> : vector<16x128xf32>
    %11 = tpu.matmul %9, %10, %cst_8 {dimension_numbers = #tpu.dot_dimension_numbers<[1], [0], [0], [1], [0, 0, 1, 1], [], []>} : vector<16x128xbf16>, vector<128x128xbf16>, vector<16x128xf32> -> vector<16x128xf32>
    %c0_9 = arith.constant 0 : index
    %c0_10 = arith.constant 0 : index
    %12 = vector.load %arg5[%c0_9, %c0_10] : memref<1x128xf32, #tpu.memory_space<vmem>>, vector<1x128xf32>
    %13 = vector.broadcast %12 : vector<1x128xf32> to vector<16x128xf32>
    %14 = arith.addf %11, %13 : vector<16x128xf32>
    %cst_11 = arith.constant 0.000000e+00 : f32
    %15 = vector.broadcast %cst_11 : f32 to vector<16x128xf32>
    %16 = arith.maximumf %14, %15 : vector<16x128xf32>
    %17 = arith.truncf %16 : vector<16x128xf32> to vector<16x128xbf16>
    %c0_12 = arith.constant 0 : index
    %c0_13 = arith.constant 0 : index
    %18 = vector.load %arg6[%c0_12, %c0_13] : memref<128x128xbf16, #tpu.memory_space<vmem>>, vector<128x128xbf16>
    %cst_14 = arith.constant dense<0.000000e+00> : vector<16x128xf32>
    %19 = tpu.matmul %17, %18, %cst_14 {dimension_numbers = #tpu.dot_dimension_numbers<[1], [0], [0], [1], [0, 0, 1, 1], [], []>} : vector<16x128xbf16>, vector<128x128xbf16>, vector<16x128xf32> -> vector<16x128xf32>
    %c0_15 = arith.constant 0 : index
    %c0_16 = arith.constant 0 : index
    %20 = vector.load %arg7[%c0_15, %c0_16] : memref<1x128xf32, #tpu.memory_space<vmem>>, vector<1x128xf32>
    %21 = vector.broadcast %20 : vector<1x128xf32> to vector<16x128xf32>
    %22 = arith.addf %19, %21 : vector<16x128xf32>
    %23 = arith.truncf %22 : vector<16x128xf32> to vector<16x128xbf16>
    %c0_17 = arith.constant 0 : index
    %c0_18 = arith.constant 0 : index
    %24 = vector.load %arg8[%c0_17, %c0_18] : memref<16x128xbf16, #tpu.memory_space<vmem>>, vector<16x128xbf16>
    tpu.vector_store %arg8[%c0_17, %c0_18], %23 {strides = array<i32>} : memref<16x128xbf16, #tpu.memory_space<vmem>>, vector<16x128xbf16>,
    return
  }
  func.func @transform_0(%arg0: i32) -> (i32, i32) {
    %c0_i32 = arith.constant 0 : i32
    %c0_i32_0 = arith.constant 0 : i32
    return %arg0, %c0_i32 : i32, i32
  }
  func.func @transform_1(%arg0: i32) -> (i32, i32) {
    %c0_i32 = arith.constant 0 : i32
    %c0_i32_0 = arith.constant 0 : i32
    %c0_i32_1 = arith.constant 0 : i32
    return %c0_i32, %c0_i32_0 : i32, i32
  }
  func.func @transform_2(%arg0: i32) -> (i32, i32) {
    %c0_i32 = arith.constant 0 : i32
    %c0_i32_0 = arith.constant 0 : i32
    %c0_i32_1 = arith.constant 0 : i32
    return %c0_i32, %c0_i32_0 : i32, i32
  }
  func.func @transform_3(%arg0: i32) -> (i32, i32) {
    %c0_i32 = arith.constant 0 : i32
    %c0_i32_0 = arith.constant 0 : i32
    %c0_i32_1 = arith.constant 0 : i32
    return %c0_i32, %c0_i32_0 : i32, i32
  }
  func.func @transform_4(%arg0: i32) -> (i32, i32) {
    %c0_i32 = arith.constant 0 : i32
    %c0_i32_0 = arith.constant 0 : i32
    %c0_i32_1 = arith.constant 0 : i32
    return %c0_i32, %c0_i32_0 : i32, i32
  }
  func.func @transform_5(%arg0: i32) -> (i32, i32) {
    %c0_i32 = arith.constant 0 : i32
    %c0_i32_0 = arith.constant 0 : i32
    %c0_i32_1 = arith.constant 0 : i32
    return %c0_i32, %c0_i32_0 : i32, i32
  }
  func.func @transform_6(%arg0: i32) -> (i32, i32) {
    %c0_i32 = arith.constant 0 : i32
    %c0_i32_0 = arith.constant 0 : i32
    %c0_i32_1 = arith.constant 0 : i32
    return %c0_i32, %c0_i32_0 : i32, i32
  }
  func.func @transform_7(%arg0: i32) -> (i32, i32) {
    %c0_i32 = arith.constant 0 : i32
    %c0_i32_0 = arith.constant 0 : i32
    return %arg0, %c0_i32 : i32, i32
  }
}

</mosaic_0001>

<bundles_post_ra>
// kernel: net_forward.1
= control target key start
LH: loop header
LB: loop body
LE: loop exit
PB: predicated region body
PF: predicated region fallthrough
CT: control target
= control target key end

     0   :  { %s1437_s24 = smov 0   ;;  %s1678_s0 = inlined_call_operand.vmem [shape: f32[32,784], index: 0, kind: input, shape index: {}]   ;;  %s1679_s1 = inlined_call_operand.vmem [shape: bf16[784,128], index: 1, kind: input, shape index: {}]   ;;  %s1680_s2 = inlined_call_operand.vmem [shape: f32[1,128], index: 2, kind: input, shape index: {}]   ;;  %s1681_s3 = inlined_call_operand.vmem [shape: bf16[128,128], index: 3, kind: input, shape index: {}]   ;;  %s1682_s4 = inlined_call_operand.vmem [shape: f32[1,128], index: 4, kind: input, shape index: {}]   ;;  %s1683_s5 = inlined_call_operand.vmem [shape: bf16[128,128], index: 5, kind: input, shape index: {}]   ;;  %s1684_s6 = inlined_call_operand.vmem [shape: f32[1,128], index: 6, kind: input, shape index: {}]   ;;  %s1685_s7 = inlined_call_operand.vmem [shape: bf16[32,128], index: 7, kind: output, shape index: {}]  }
   0x1 LB: > { %s1035_s25 = sadd.s32 4294967295, %s1395_s24   ;;  %p1039_p0 = scmp.ge.s32.totalorder %s1395_s24, 1  ;;  %s1395_s24 = sphi %s1437_s24, %s17_s24  }
   0x2   : > { %p239_p1 = scmp.lt.s32.totalorder %s1395_s24, 3 }
   0x4   : > { %p240_p2 = pnand %p1039_p0, %p239_p1 }
   0x5   : > { %s1040_s29 = sshll.u32 (!%p240_p2), %s1035_s25, 1 }
   0x6   : > { %243 = sbr.rel (%p240_p2) target bundleno = 510 (0x1fe), region = 48  ;;  %p273_p3 = scmp.lt.s32.totalorder (!%p240_p2), %s1040_s29, 3 }
   0xb   : > { %v1314_v0 = vld [vmem:[%s1679_s1 + $0x38] sm:$0xff]  ;;  %v1313_v4 = vld [vmem:[%s1679_s1 + $0x30] sm:$0xff]  ;;  %v1312_v8 = vld [vmem:[%s1679_s1 + $0x28] sm:$0xff]  ;;  %s1687_s29 = smov (!%p273_p3, %s1040_s29), 3  ;;  %vm703_vm0 = vcmask 130048  }
   0xc   : > { %v1322_v1 = vld [vmem:[%s1679_s1 + $0x78] sm:$0xff]  ;;  %707 = vmatpush.bf16.msra.mxu0 %v1314_v0  ;;  %v1321_v5 = vld [vmem:[%s1679_s1 + $0x70] sm:$0xff]  ;;  %v1320_v9 = vld [vmem:[%s1679_s1 + $0x68] sm:$0xff]  ;;  %s1377_s10 = smul.u32 56, %s1687_s29  ;;  %s1043_s18 = sshll.u32 %s1687_s29, 2 }
   0xd   : > { %v1330_v2 = vld [vmem:[%s1679_s1 + $0xb8] sm:$0xff]  ;;  %721 = vmatpush.bf16.msra.mxu1 %v1322_v1  ;;  %v1329_v6 = vld [vmem:[%s1679_s1 + $0xb0] sm:$0xff]  ;;  %v1328_v10 = vld [vmem:[%s1679_s1 + $0xa8] sm:$0xff]  ;;  %s283_s22 = scalar_lea.vmem %s1685_s7, %s1043_s18 }
   0xe   : > { %v1338_v3 = vld [vmem:[%s1679_s1 + $0xf8] sm:$0xff]  ;;  %735 = vmatpush.bf16.msra.mxu2 %v1330_v2  ;;  %v1337_v7 = vld [vmem:[%s1679_s1 + $0xf0] sm:$0xff]  ;;  %v1336_v11 = vld [vmem:[%s1679_s1 + $0xe8] sm:$0xff]  ;;  %s1535_s20 = scalar_lea.vmem %s1678_s0, %s1377_s10 }
   0xf   : > { %749 = vmatpush.bf16.msra.mxu3 %v1338_v3  ;;  %v1311_v12 = vld [vmem:[%s1679_s1 + $0x20] sm:$0xff]  ;;  %v1310_v16 = vld [vmem:[%s1679_s1 + $0x18] sm:$0xff]  ;;  %v1309_v20 = vld [vmem:[%s1679_s1 + $0x10] sm:$0xff] }
  0x10   : > { %708 = vmatpush.bf16.msra.mxu0 %v1313_v4  ;;  %v1319_v13 = vld [vmem:[%s1679_s1 + $0x60] sm:$0xff]  ;;  %v1318_v17 = vld [vmem:[%s1679_s1 + $0x58] sm:$0xff]  ;;  %v1317_v21 = vld [vmem:[%s1679_s1 + $0x50] sm:$0xff] }
  0x11   : > { %722 = vmatpush.bf16.msra.mxu1 %v1321_v5  ;;  %v1327_v14 = vld [vmem:[%s1679_s1 + $0xa0] sm:$0xff]  ;;  %v1326_v18 = vld [vmem:[%s1679_s1 + $0x98] sm:$0xff]  ;;  %v1325_v22 = vld [vmem:[%s1679_s1 + $0x90] sm:$0xff] }
  0x12   : > { %736 = vmatpush.bf16.msra.mxu2 %v1329_v6  ;;  %v1335_v15 = vld [vmem:[%s1679_s1 + $0xe0] sm:$0xff]  ;;  %v1334_v19 = vld [vmem:[%s1679_s1 + $0xd8] sm:$0xff]  ;;  %v1333_v23 = vld [vmem:[%s1679_s1 + $0xd0] sm:$0xff] }
  0x13   : > { %750 = vmatpush.bf16.msra.mxu3 %v1337_v7  ;;  %v1308_v24 = vld [vmem:[%s1679_s1 + $0x8] sm:$0xff]  ;;  %v1307_v28 = vld [vmem:[%s1679_s1] sm:$0xff]  ;;  %v293_v31 = vld [vmem:[%s1535_s20 + $0x38] sm:$0xff] }
  0x14   : > { %709 = vmatpush.bf16.msra.mxu0 %v1312_v8  ;;  %v1316_v25 = vld [vmem:[%s1679_s1 + $0x48] sm:$0xff]  ;;  %v1315_v29 = vld [vmem:[%s1679_s1 + $0x40] sm:$0xff]  ;;  %v1346_v34 = vld [vmem:[%s1679_s1 + $0x138] sm:$0xff] }
  0x15   : > { %723 = vmatpush.bf16.msra.mxu1 %v1320_v9  ;;  %v1324_v26 = vld [vmem:[%s1679_s1 + $0x88] sm:$0xff]  ;;  %v286_v30 = vld [vmem:[%s1535_s20] sm:$0xff]  ;;  %v1354_v35 = vld [vmem:[%s1679_s1 + $0x178] sm:$0xff] }
  0x16   : > { %737 = vmatpush.bf16.msra.mxu2 %v1328_v10  ;;  %v1332_v27 = vld [vmem:[%s1679_s1 + $0xc8] sm:$0xff]  ;;  %v294_v33 = vld [vmem:[%s1535_s20 + $0x40] sm:$0xff]  ;;  %v288_v38 = vld [vmem:[%s1535_s20 + $0x10] sm:$0xff]  ;;  %v300_v40 = vpack.c.bf16 %v293_v31, %v286_v30 }
  0x17   : > { %751 = vmatpush.bf16.msra.mxu3 %v1336_v11  ;;  %v287_v32 = vld [vmem:[%s1535_s20 + $0x8] sm:$0xff]  ;;  %v1323_v36 = vld [vmem:[%s1679_s1 + $0x80] sm:$0xff]  ;;  %v289_v41 = vld [vmem:[%s1535_s20 + $0x18] sm:$0xff] }
  0x18   : > { %710 = vmatpush.bf16.msra.mxu0 %v1311_v12  ;;  %v1331_v37 = vld [vmem:[%s1679_s1 + $0xc0] sm:$0xff]  ;;  %v295_v39 = vld [vmem:[%s1535_s20 + $0x48] sm:$0xff]  ;;  %v296_v42 = vld [vmem:[%s1535_s20 + $0x50] sm:$0xff]  ;;  %v301_v43 = vpack.c.bf16 %v294_v33, %v287_v32 }
  0x19   : > { %724 = vmatpush.bf16.msra.mxu1 %v1319_v13  ;;  %v1355_v44 = vld [vmem:[%s1679_s1 + $0x180] sm:$0xff]  ;;  %v1345_v45 = vld [vmem:[%s1679_s1 + $0x130] sm:$0xff]  ;;  %v302_v47 = vpack.c.bf16 %v295_v39, %v288_v38  ;;  %v303_v48 = vpack.c.bf16 %v296_v42, %v289_v41  ;;  %v1344_v49 = vld [vmem:[%s1679_s1 + $0x128] sm:$0xff] }
  0x1a   : > { %738 = vmatpush.bf16.msra.mxu2 %v1327_v14  ;;  %v1353_v46 = vld [vmem:[%s1679_s1 + $0x170] sm:$0xff]  ;;  %v1352_v50 = vld [vmem:[%s1679_s1 + $0x168] sm:$0xff]  ;;  %v1343_v51 = vld [vmem:[%s1679_s1 + $0x120] sm:$0xff] }
  0x1b   : > { %752 = vmatpush.bf16.msra.mxu3 %v1335_v15  ;;  %v1351_v52 = vld [vmem:[%s1679_s1 + $0x160] sm:$0xff]  ;;  %v1342_v53 = vld [vmem:[%s1679_s1 + $0x118] sm:$0xff]  ;;  %v292_v55 = vld [vmem:[%s1535_s20 + $0x30] sm:$0xff] }
  0x1c   : > { %711 = vmatpush.bf16.msra.mxu0 %v1310_v16  ;;  %v1350_v54 = vld [vmem:[%s1679_s1 + $0x158] sm:$0xff]  ;;  %v299_v56 = vld [vmem:[%s1535_s20 + $0x68] sm:$0xff]  ;;  %v1341_v57 = vld [vmem:[%s1679_s1 + $0x110] sm:$0xff] }
  0x1d   : > { %725 = vmatpush.bf16.msra.mxu1 %v1318_v17  ;;  %v1349_v58 = vld [vmem:[%s1679_s1 + $0x150] sm:$0xff]  ;;  %v306_v59 = vpack.c.bf16 %v299_v56, %v292_v55  ;;  %v1340_v60 = vld [vmem:[%s1679_s1 + $0x108] sm:$0xff]  ;;  %v1339_v62 = vld [vmem:[%s1679_s1 + $0x100] sm:$0xff] }
  0x1e   : > { %739 = vmatpush.bf16.msra.mxu2 %v1326_v18  ;;  %v1348_v61 = vld [vmem:[%s1679_s1 + $0x148] sm:$0xff]  ;;  %v1347_v63 = vld [vmem:[%s1679_s1 + $0x140] sm:$0xff]  ;;  %v297_v1 = vld [vmem:[%s1535_s20 + $0x58] sm:$0xff] }
  0x1f   : > { %753 = vmatpush.bf16.msra.mxu3 %v1334_v19  ;;  %v290_v0 = vld [vmem:[%s1535_s20 + $0x20] sm:$0xff]  ;;  %v291_v2 = vld [vmem:[%s1535_s20 + $0x28] sm:$0xff]  ;;  %v1363_v6 = vld [vmem:[%s1681_s3 + $0x38] sm:$0xff] }
  0x20   : > { %712 = vmatpush.bf16.msra.mxu0 %v1309_v20  ;;  %v298_v3 = vld [vmem:[%s1535_s20 + $0x60] sm:$0xff]  ;;  %v304_v4 = vpack.c.bf16 %v297_v1, %v290_v0  ;;  %v1362_v7 = vld [vmem:[%s1681_s3 + $0x30] sm:$0xff]  ;;  %v1361_v8 = vld [vmem:[%s1681_s3 + $0x28] sm:$0xff] }
  0x21   : > { %726 = vmatpush.bf16.msra.mxu1 %v1317_v21  ;;  %v305_v5 = vpack.c.bf16 %v298_v3, %v291_v2  ;;  %v1360_v9 = vld [vmem:[%s1681_s3 + $0x20] sm:$0xff]  ;;  %v1359_v10 = vld [vmem:[%s1681_s3 + $0x18] sm:$0xff]  ;;  %v1358_v11 = vld [vmem:[%s1681_s3 + $0x10] sm:$0xff] }
  0x22   : > { %740 = vmatpush.bf16.msra.mxu2 %v1325_v22  ;;  %v1357_v12 = vld [vmem:[%s1681_s3 + $0x8] sm:$0xff]  ;;  %v1356_v16 = vld [vmem:[%s1681_s3] sm:$0xff]  ;;  %v1371_v18 = vld [vmem:[%s1683_s5 + $0x38] sm:$0xff] }
  0x23   : > { %754 = vmatpush.bf16.msra.mxu3 %v1333_v23  ;;  %v1386_v17 = vld [vmem:[%s1680_s2] ss:$0 sm:$0xff]  ;;  %v1370_v20 = vld [vmem:[%s1683_s5 + $0x30] sm:$0xff] }
  0x24   : > { %713 = vmatpush.bf16.msra.mxu0 %v1308_v24  ;;  %v1387_v55 = vld [vmem:[%s1682_s4] ss:$0 sm:$0xff] }
  0x25   : > { %727 = vmatpush.bf16.msra.mxu1 %v1316_v25  ;;  %v1369_v25 = vld [vmem:[%s1683_s5 + $0x28] sm:$0xff] }
  0x26   : > { %741 = vmatpush.bf16.msra.mxu2 %v1324_v26 }
  0x27   : > { %755 = vmatpush.bf16.msra.mxu3 %v1332_v27 }
  0x28   : > { %714 = vmatpush.bf16.msra.mxu0 %v1307_v28 }
  0x29   : > { %728 = vmatpush.bf16.msra.mxu1 %v1315_v29  ;;  %v1368_v29 = vld [vmem:[%s1683_s5 + $0x20] sm:$0xff] }
  0x2a   : > { %742 = vmatpush.bf16.msra.mxu2 %v1323_v36 }
  0x2b   : > { %756 = vmatpush.bf16.msra.mxu3 %v1331_v37  ;;  %715 = vmatmul.bf16.vlgmr.msra.gmra.mxu0 %v300_v40 }
  0x2c   : > { %763 = vmatpush.bf16.msrb.mxu0 %v1346_v34  ;;  %729 = vmatmul.bf16.vlgmr.msra.gmra.mxu1 %v301_v43 }
  0x2d   : > { %777 = vmatpush.bf16.msrb.mxu1 %v1354_v35  ;;  %743 = vmatmul.bf16.vlgmr.msra.gmra.mxu2 %v302_v47 }
  0x2e   : > { %798 = vmatpush.bf16.msrb.mxu2 %v1355_v44  ;;  %757 = vmatmul.bf16.vlgmr.msra.gmra.mxu3 %v303_v48 }
  0x2f   : > { %876 = vmatpush.bf16.msrb.mxu3 %v1363_v6 }
  0x30   : > { %764 = vmatpush.bf16.msrb.mxu0 %v1345_v45 }
  0x31   : > { %778 = vmatpush.bf16.msrb.mxu1 %v1353_v46 }
  0x32   : > { %961 = vmatpush.bf16.msra.mxu2 %v1371_v18 }
  0x33   : > { %877 = vmatpush.bf16.msrb.mxu3 %v1362_v7 }
  0x34   : > { %765 = vmatpush.bf16.msrb.mxu0 %v1344_v49 }
  0x35   : > { %779 = vmatpush.bf16.msrb.mxu1 %v1352_v50  ;;  %v1367_v50 = vld [vmem:[%s1683_s5 + $0x18] sm:$0xff] }
  0x36   : > { %962 = vmatpush.bf16.msra.mxu2 %v1370_v20 }
  0x37   : > { %878 = vmatpush.bf16.msrb.mxu3 %v1361_v8 }
  0x38   : > { %766 = vmatpush.bf16.msrb.mxu0 %v1343_v51  ;;  %v1366_v51 = vld [vmem:[%s1683_s5 + $0x10] sm:$0xff] }
  0x39   : > { %780 = vmatpush.bf16.msrb.mxu1 %v1351_v52  ;;  %v1365_v52 = vld [vmem:[%s1683_s5 + $0x8] sm:$0xff] }
  0x3a   : > { %963 = vmatpush.bf16.msra.mxu2 %v1369_v25 }
  0x3b   : > { %879 = vmatpush.bf16.msrb.mxu3 %v1360_v9 }
  0x3c   : > { %767 = vmatpush.bf16.msrb.mxu0 %v1342_v53  ;;  %v1364_v53 = vld [vmem:[%s1683_s5] sm:$0xff] }
  0x3d   : > { %781 = vmatpush.bf16.msrb.mxu1 %v1350_v54  ;;  %1240 = vmatmul.msk.bf16.vlgmr.msrb.gmra.mxu2 %vm703_vm0, %v306_v59 }
  0x3e   : > { %964 = vmatpush.bf16.msra.mxu2 %v1368_v29 }
  0x3f   : > { %880 = vmatpush.bf16.msrb.mxu3 %v1359_v10 }
  0x40   : > { %768 = vmatpush.bf16.msrb.mxu0 %v1341_v57 }
  0x41   : > { %782 = vmatpush.bf16.msrb.mxu1 %v1349_v58 }
  0x42   : > { %965 = vmatpush.bf16.msra.mxu2 %v1367_v50 }
  0x43   : > { %881 = vmatpush.bf16.msrb.mxu3 %v1358_v11 }
  0x44   : > { %769 = vmatpush.bf16.msrb.mxu0 %v1340_v60 }
  0x45   : > { %783 = vmatpush.bf16.msrb.mxu1 %v1348_v61 }
  0x46   : > { %966 = vmatpush.bf16.msra.mxu2 %v1366_v51 }
  0x47   : > { %882 = vmatpush.bf16.msrb.mxu3 %v1357_v12 }
  0x48   : > { %770 = vmatpush.bf16.msrb.mxu0 %v1339_v62 }
  0x49   : > { %784 = vmatpush.bf16.msrb.mxu1 %v1347_v63  ;;  %v1388_v63 = vld [vmem:[%s1684_s6] ss:$0 sm:$0xff] }
  0x4a   : > { %967 = vmatpush.bf16.msra.mxu2 %v1365_v52 }
  0x4b   : > { %771 = vmatmul.bf16.vlgmr.msrb.gmra.mxu0 %v304_v4  ;;  %883 = vmatpush.bf16.msrb.mxu3 %v1356_v16 }
  0x4c   : > { %785 = vmatmul.bf16.vlgmr.msrb.gmra.mxu1 %v305_v5 }
  0x4e   : > { %968 = vmatpush.bf16.msra.mxu2 %v1364_v53 }
  0xa8   : > { %v716_v13 = vpop.f32.mrf.mxu0 }
  0xa9   : > { %v730_v14 = vpop.f32.mrf.mxu1  ;;  %v717_v19 = vadd.f32 %v1386_v17, %v716_v13 }
  0xab   : > { %v731_v24 = vadd.f32 %v730_v14, %v717_v19 }
  0xb0   : > { %v744_v15 = vpop.f32.mrf.mxu2  ;;  %v718_v21 = vpop.f32.mrf.mxu0 }
  0xb1   : > { %v732_v22 = vpop.f32.mrf.mxu1  ;;  %v758_v26 = vpop.f32.mrf.mxu3  ;;  %v719_v27 = vadd.f32 %v1386_v17, %v718_v21  ;;  %v745_v28 = vadd.f32 %v744_v15, %v731_v24 }
  0xb3   : > { %v733_v30 = vadd.f32 %v732_v22, %v719_v27  ;;  %v759_v33 = vadd.f32 %v758_v26, %v745_v28 }
  0xb8   : > { %v746_v23 = vpop.f32.mrf.mxu2 }
  0xb9   : > { %v747_v35 = vadd.f32 %v746_v23, %v733_v30  ;;  %v760_v37 = vpop.f32.mrf.mxu3 }
  0xbb   : > { %v761_v38 = vadd.f32 %v760_v37, %v747_v35 }
  0xc0   : > { %v800_v34 = vpop.f32.mrf.mxu2 }
  0xc8   : > { %v772_v31 = vpop.f32.mrf.mxu0  ;;  %v802_v45 = vpop.f32.mrf.mxu2 }
  0xc9   : > { %v786_v32 = vpop.f32.mrf.mxu1  ;;  %v773_v36 = vadd.f32 %v772_v31, %v759_v33 }
  0xcb   : > { %v787_v39 = vadd.f32 %v786_v32, %v773_v36 }
  0xcd   : > { %v801_v43 = vadd.f32 %v800_v34, %v787_v39 }
  0xcf   : > { %v805_v47 = vmax.f32 %v801_v43, 0.0 }
  0xd0   : > { %v774_v40 = vpop.f32.mrf.mxu0 }
  0xd1   : > { %v775_v41 = vadd.f32 %v774_v40, %v761_v38  ;;  %v788_v42 = vpop.f32.mrf.mxu1 }
  0xd3   : > { %v789_v44 = vadd.f32 %v788_v42, %v775_v41 }
  0xd5   : > { %v803_v46 = vadd.f32 %v802_v45, %v789_v44 }
  0xd7   : > { %v806_v48 = vmax.f32 %v803_v46, 0.0 }
  0xd9   : > { %v807_v49 = vpack.c.bf16 %v806_v48, %v805_v47 }
  0xdb   : > { %884 = vmatmul.bf16.vlgmr.msrb.gmra.mxu3 %v807_v49 }
 0x15e   : > { %v885_v54 = vpop.f32.mrf.mxu3 }
 0x15f   : > { %v886_v56 = vadd.f32 %v1387_v55, %v885_v54 }
 0x161   : > { %v890_v59 = vmax.f32 %v886_v56, 0.0 }
 0x166   : > { %v887_v57 = vpop.f32.mrf.mxu3 }
 0x167   : > { %v888_v58 = vadd.f32 %v1387_v55, %v887_v57 }
 0x169   : > { %v891_v60 = vmax.f32 %v888_v58, 0.0 }
 0x16b   : > { %v892_v61 = vpack.c.bf16 %v891_v60, %v890_v59 }
 0x16d   : > { %969 = vmatmul.bf16.vlgmr.msra.gmra.mxu2 %v892_v61 }
 0x1f0   : > { %v970_v62 = vpop.f32.mrf.mxu2 }
 0x1f1   : > { %v971_v1 = vadd.f32 %v1388_v63, %v970_v62 }
 0x1f8   : > { %v972_v0 = vpop.f32.mrf.mxu2 }
 0x1f9   : > { %v973_v2 = vadd.f32 %v1388_v63, %v972_v0 }
 0x1fb   : > { %v1375_v3 = vpack.c.bf16 %v973_v2, %v971_v1 }
 0x1fd   : > { %1376 = vst [vmem:[%s283_s22] sm:$0xff] %v1375_v3  }
 0x1fe PF: > { %s17_s24 = sadd.s32 1, %s1395_s24  }
 0x1ff   : > { %p14_p4 = scmp.ge.s32.totalorder %s17_s24, 4  }
 0x201   :  { %16 = sbr.rel (!%p14_p4) target bundleno = 1 (0x1), region = 78 }

</bundles_post_ra>
